<compile_context>
chip_gen: v6e
topology: v6e:2x2x1
jax: 0.10.0
libtpu: 0.0.40
codegen_flags: <defaults>
</compile_context>

<pallas_src>
import functools

import jax
import jax.numpy as jnp
import numpy as np
from jax import lax
from jax.experimental import pallas as pl
from jax.experimental.pallas import tpu as pltpu


# -----------------------------------------------------------------------------
# Fused kernel: conv1+lrelu -> conv2+lrelu -> convT(2x2, s=2)+lrelu, all in VMEM
# -----------------------------------------------------------------------------
def _fused_double_conv_u1_kernel(x_ref, w1_ref, b1_ref, w2_ref, b2_ref,
                                 wt_ref, bt_ref, o_ref):
    """One grid step = one block of images; intermediates never leave VMEM.

    Lane-dense layouts:
      x_ref : (NB, H, K1)        bf16, lanes = (w, ci)   (ci zero-padded to 128 lanes)
      w1_ref: (K1, f*M)          bf16, f banded (K1, M) blocks stacked along columns
      w2_ref: (M,  f*M)          bf16
      wt_ref: (M,  4*M)          bf16, cols ordered (ki, w, kj, co)
      b*_ref: (1, M) / (1, 4*M)  f32
      o_ref : (NB, H, 4*M)       f32  (row h holds output rows 2h and 2h+1)
    """
    NB, H, K1 = x_ref.shape
    M = w2_ref.shape[0]                       # W * C
    f = w2_ref.shape[1] // M                  # filter height (3)
    pad = (f - 1) // 2
    R = NB * H

    # Per-image row index, used to zero the contributions that fall outside the
    # 'same' padding at the top/bottom rows of each image. Computed once, shared
    # by both convs.
    hm = lax.broadcasted_iota(jnp.int32, (R, M), 0) % H

    def lrelu(v):
        return jnp.where(v > 0, v, 0.01 * v)

    def conv_same(rows_bf16, w_ref, b_ref):
        # ONE MXU matmul computes every filter-row tap at once -> (R, f*M).
        t = jnp.dot(rows_bf16, w_ref[...], preferred_element_type=jnp.float32)
        acc = t[:, pad * M:(pad + 1) * M]                 # center tap, no shift
        for kh in range(f):                                # static & tiny (f = 3)
            if kh == pad:
                continue
            # y[h] += t[h + kh - pad, kh-block]  ==  roll the kh block by pad-kh
            blk = pltpu.roll(t[:, kh * M:(kh + 1) * M],
                             shift=(pad - kh) % R, axis=0)
            if kh < pad:                                   # invalid at top rows
                blk = jnp.where(hm >= pad - kh, blk, 0.0)
            else:                                          # invalid at bottom rows
                blk = jnp.where(hm < H - (kh - pad), blk, 0.0)
            acc = acc + blk
        return lrelu(acc + b_ref[...])                     # (R, M) f32

    x_rows = x_ref[...].reshape(R, K1)                     # free leading-dim merge
    y1 = conv_same(x_rows, w1_ref, b1_ref)                 # (R, M)
    y2 = conv_same(y1.astype(jnp.bfloat16), w2_ref, b2_ref)

    # ConvTranspose2d(k=2, s=2): one wide block-diagonal matmul.
    u = jnp.dot(y2.astype(jnp.bfloat16), wt_ref[...],
                preferred_element_type=jnp.float32)        # (R, 4*M)
    u = lrelu(u + bt_ref[...])
    o_ref[...] = u.reshape(NB, H, 4 * M)


# -----------------------------------------------------------------------------
# Host-side weight repacking (call ONCE, cache the result)
# -----------------------------------------------------------------------------
def _band_conv_weights(w, W):
    """PyTorch Conv2d weight (Cout, Cin, f, f) -> (f, W*Cin, W*Cout) banded
    matrices B[kh] s.t. rows@B[kh] applies the kh-th filter row over the
    lane-dense (W*Cin) axis with 'same' zero padding in W."""
    Cout, Cin, f, _ = w.shape
    pad = (f - 1) // 2
    jx = jnp.arange(W)[:, None]                 # source column block
    j = jnp.arange(W)[None, :]                  # destination column block
    kw = jx - j + pad                           # (W, W) tap index
    valid = (kw >= 0) & (kw < f)
    kwc = jnp.clip(kw, 0, f - 1)
    w_t = jnp.transpose(w, (2, 3, 1, 0))        # (kh, kw, Cin, Cout)
    blk = w_t[:, kwc]                           # (f, jx, j, Cin, Cout)
    blk = jnp.where(valid[None, :, :, None, None], blk, 0.0)
    # rows ordered (jx, ci), cols ordered (j, co)
    return jnp.transpose(blk, (0, 1, 3, 2, 4)).reshape(f, W * Cin, W * Cout)


def _convT_weight(wt, W):
    """PyTorch ConvTranspose2d weight (Cin, Cout, 2, 2) -> (W*Cin, 4*W*Cout)
    block-diagonal matrix with output columns ordered (ki, j, kj, co)."""
    Cin, Cout = wt.shape[0], wt.shape[1]
    blocks = jnp.transpose(wt, (2, 0, 3, 1)).reshape(2, Cin, 2 * Cout)
    eye = jnp.eye(W, dtype=wt.dtype)
    btw = jnp.einsum('xj,kcq->xckjq', eye, blocks)     # (jx, ci, ki, j, q)
    return btw.reshape(W * Cin, 2 * W * 2 * Cout)


def pack_double_conv_u1_params(params, W, f_size=3, weight_dtype=jnp.bfloat16):
    """Repack PyTorch-layout weights for the fused kernel. Run once; reuse the
    result across forward calls (the repack is hoisted out of the forward)."""
    w1, b1, w2, b2, wt, bt = params
    assert w1.shape[2] == f_size and f_size % 2 == 1
    assert wt.shape[2] == 2 and wt.shape[3] == 2, \
        "kernel implements ConvTranspose2d(kernel_size=2, stride=2)"
    C, Cin = w1.shape[0], w1.shape[1]
    M = W * C

    # Pad Cin so the input lane width W*Cin fills whole 128-lane vregs.
    lane_in = W * Cin
    tgt = ((lane_in + 127) // 128) * 128
    cin_pad = tgt // W if tgt % W == 0 else Cin
    cin_pad = max(cin_pad, Cin)
    if cin_pad != Cin:
        w1 = jnp.pad(w1, ((0, 0), (0, cin_pad - Cin), (0, 0), (0, 0)))

    b1w = _band_conv_weights(w1, W)                       # (f, W*cin_pad, M)
    b2w = _band_conv_weights(w2, W)                       # (f, M, M)
    # Stack the f per-filter-row blocks along output columns -> ONE matmul/conv.
    w1s = jnp.transpose(b1w, (1, 0, 2)).reshape(W * cin_pad, f_size * M)
    w2s = jnp.transpose(b2w, (1, 0, 2)).reshape(M, f_size * M)
    wts = _convT_weight(wt, W)                            # (M, 4*M)

    w1s = w1s.astype(weight_dtype)
    w2s = w2s.astype(weight_dtype)
    wts = wts.astype(weight_dtype)
    b1r = jnp.tile(b1, W).reshape(1, M).astype(jnp.float32)
    b2r = jnp.tile(b2, W).reshape(1, M).astype(jnp.float32)
    btr = jnp.tile(bt, 4 * W).reshape(1, 4 * M).astype(jnp.float32)
    return (w1s, b1r, w2s, b2r, wts, btr)


# -----------------------------------------------------------------------------
# Forward passes
# -----------------------------------------------------------------------------
def double_conv_u1_forward_nhwc(x_nhwc, packed, f_size=3, imgs_per_step=1):
    """Lane-dense entry point: (N, H, W, Cin) -> (N, 2H, 2W, C), NHWC both ways."""
    w1s, b1r, w2s, b2r, wts, btr = packed
    N, H, W, Cin = x_nhwc.shape
    M = w2s.shape[0]                      # W * C
    C = M // W
    K1 = w1s.shape[0]                     # W * cin_pad
    cin_pad = K1 // W
    nb = imgs_per_step
    assert N % nb == 0, "imgs_per_step must divide N"

    x = x_nhwc
    if cin_pad != Cin:                    # zero-pad channels to fill 128 lanes
        x = jnp.pad(x, ((0, 0), (0, 0), (0, 0), (0, cin_pad - Cin)))
    x2d = x.reshape(N, H, K1).astype(jnp.bfloat16)

    # NOTE(scaling): weight blocks grow as f*(W*C)^2 and 4*(W*C)^2. At W*C=128
    # (here) they total ~0.3 MiB bf16; past W*C ~ 512 switch to a W-tiled /
    # compact-weight formulation and/or pipeline_mode=pl.Buffered(1) for them.
    out2d = pl.pallas_call(
        _fused_double_conv_u1_kernel,
        out_shape=jax.ShapeDtypeStruct((N, H, 4 * M), jnp.float32),
        grid=(N // nb,),
        in_specs=[
            pl.BlockSpec((nb, H, K1), lambda n: (n, 0, 0)),        # x
            pl.BlockSpec((K1, f_size * M), lambda n: (0, 0)),      # conv1 W (resident)
            pl.BlockSpec((1, M), lambda n: (0, 0)),                # conv1 b
            pl.BlockSpec((M, f_size * M), lambda n: (0, 0)),       # conv2 W (resident)
            pl.BlockSpec((1, M), lambda n: (0, 0)),                # conv2 b
            pl.BlockSpec((M, 4 * M), lambda n: (0, 0)),            # convT W (resident)
            pl.BlockSpec((1, 4 * M), lambda n: (0, 0)),            # convT b
        ],
        out_specs=pl.BlockSpec((nb, H, 4 * M), lambda n: (n, 0, 0)),
        compiler_params=pltpu.CompilerParams(
            dimension_semantics=("parallel",),
            vmem_limit_bytes=32 * 1024 * 1024),
    )(x2d, w1s, b1r, w2s, b2r, wts, btr)

    # lanes ordered (ki, j, kj, c) -> pure metadata reshape to NHWC
    return out2d.reshape(N, 2 * H, 2 * W, C)


def double_conv_u1_forward(x_nchw, packed, f_size=3, imgs_per_step=1):
    """PyTorch-convention wrapper (NCHW in / NCHW out). Prefer the NHWC entry
    point in a real pipeline so the two transposes (extra HBM round trips)
    disappear."""
    x_nhwc = jnp.transpose(x_nchw, (0, 2, 3, 1))
    y = double_conv_u1_forward_nhwc(x_nhwc, packed, f_size=f_size,
                                    imgs_per_step=imgs_per_step)
    return jnp.transpose(y, (0, 3, 1, 2))


# -----------------------------------------------------------------------------
# Pure-JAX reference (lax convs) for correctness check
# -----------------------------------------------------------------------------
def _lrelu(v):
    return jnp.where(v > 0, v, 0.01 * v)


def reference_forward(x_nchw, params):
    w1, b1, w2, b2, wt, bt = params
    y = lax.conv_general_dilated(
        x_nchw, w1, (1, 1), "SAME",
        dimension_numbers=("NCHW", "OIHW", "NCHW")) + b1[None, :, None, None]
    y = _lrelu(y)
    y = lax.conv_general_dilated(
        y, w2, (1, 1), "SAME",
        dimension_numbers=("NCHW", "OIHW", "NCHW")) + b2[None, :, None, None]
    y = _lrelu(y)
    # ConvTranspose2d(k=2, s=2, p=0) == lhs-dilated conv with flipped kernel
    wt_flip = wt[:, :, ::-1, ::-1]                        # (Cin, Cout, 2, 2)
    y = lax.conv_general_dilated(
        y, wt_flip, window_strides=(1, 1), padding=((1, 1), (1, 1)),
        lhs_dilation=(2, 2),
        dimension_numbers=("NCHW", "IOHW", "NCHW")) + bt[None, :, None, None]
    y = _lrelu(y)
    return y


# -----------------------------------------------------------------------------
if __name__ == "__main__":
    in_channels, out_channels, f_size, st_size = 4, 8, 3, 2
    N, H, W = 2, 16, 16

    key = jax.random.PRNGKey(0)
    kx, k1, k2, k3, k4, k5, k6 = jax.random.split(key, 7)

    x = jax.random.normal(kx, (N, in_channels, H, W), jnp.float32)

    # deterministic synthetic parameters (PyTorch layouts: OIHW / IOHW)
    w1 = 0.1 * jax.random.normal(k1, (out_channels, in_channels, f_size, f_size), jnp.float32)
    b1 = 0.1 * jax.random.normal(k2, (out_channels,), jnp.float32)
    w2 = 0.1 * jax.random.normal(k3, (out_channels, out_channels, f_size, f_size), jnp.float32)
    b2 = 0.1 * jax.random.normal(k4, (out_channels,), jnp.float32)
    wt = 0.1 * jax.random.normal(k5, (out_channels, out_channels, 2, 2), jnp.float32)
    bt = 0.1 * jax.random.normal(k6, (out_channels,), jnp.float32)
    params = (w1, b1, w2, b2, wt, bt)

    # One-time weight repack (hoisted out of the forward; reuse across calls).
    packed = pack_double_conv_u1_params(params, W=W, f_size=f_size)
    packed = jax.block_until_ready(packed)

    fwd = jax.jit(functools.partial(double_conv_u1_forward, f_size=f_size))
    out = jax.block_until_ready(fwd(x, packed))

    assert out.shape == (N, out_channels, H * st_size, W * st_size), out.shape

    ref = jax.block_until_ready(reference_forward(x, params))
    # bf16 weights/activations (MXU-native) with f32 accumulation -> ~1e-3 abs err.
    np.testing.assert_allclose(np.asarray(out), np.asarray(ref),
                               rtol=2e-2, atol=2e-2)

    print("KERNEL_OK")
</pallas_src>

<mosaic_0001>
module attributes {stable_mosaic.version = 11 : i64} {
  func.func @_fused_double_conv_u1_kernel(%arg0: i32, %arg1: memref<1x16x128xbf16, #tpu.memory_space<vmem>>, %arg2: memref<128x384xbf16, #tpu.memory_space<vmem>>, %arg3: memref<1x128xf32, #tpu.memory_space<vmem>>, %arg4: memref<128x384xbf16, #tpu.memory_space<vmem>>, %arg5: memref<1x128xf32, #tpu.memory_space<vmem>>, %arg6: memref<128x512xbf16, #tpu.memory_space<vmem>>, %arg7: memref<1x512xf32, #tpu.memory_space<vmem>>, %arg8: memref<1x16x512xf32, #tpu.memory_space<vmem>>) attributes {dimension_semantics = [#tpu.dimension_semantics<parallel>], iteration_bounds = array<i64: 2>, scalar_prefetch = 0 : i64, scratch_operands = 0 : i64, tpu.core_type = #tpu.core_type<tc>, window_params = [{transform_indices = @transform_0, window_bounds = array<i64: 1, 16, 128>}, {pipeline_mode = #tpu.pipeline_mode<synchronous>, transform_indices = @transform_1, window_bounds = array<i64: 128, 384>}, {pipeline_mode = #tpu.pipeline_mode<synchronous>, transform_indices = @transform_2, window_bounds = array<i64: 1, 128>}, {pipeline_mode = #tpu.pipeline_mode<synchronous>, transform_indices = @transform_3, window_bounds = array<i64: 128, 384>}, {pipeline_mode = #tpu.pipeline_mode<synchronous>, transform_indices = @transform_4, window_bounds = array<i64: 1, 128>}, {pipeline_mode = #tpu.pipeline_mode<synchronous>, transform_indices = @transform_5, window_bounds = array<i64: 128, 512>}, {pipeline_mode = #tpu.pipeline_mode<synchronous>, transform_indices = @transform_6, window_bounds = array<i64: 1, 512>}, {transform_indices = @transform_7, window_bounds = array<i64: 1, 16, 512>}]} {
    %0 = tpu.iota {dimensions = array<i32: 0>} : vector<16x128xi32>
    %c16_i32 = arith.constant 16 : i32
    %c0_i32 = arith.constant 0 : i32
    %1 = arith.cmpi eq, %c16_i32, %c0_i32 : i32
    %c1_i32 = arith.constant 1 : i32
    %2 = arith.select %1, %c1_i32, %c16_i32 : i32
    %3 = vector.broadcast %2 : i32 to vector<16x128xi32>
    %4 = arith.remsi %0, %3 : vector<16x128xi32>
    %c0_i32_0 = arith.constant 0 : i32
    %5 = vector.broadcast %c0_i32_0 : i32 to vector<16x128xi32>
    %6 = arith.cmpi ne, %4, %5 : vector<16x128xi32>
    %c0_i32_1 = arith.constant 0 : i32
    %7 = vector.broadcast %c0_i32_1 : i32 to vector<16x128xi32>
    %8 = arith.cmpi slt, %4, %7 : vector<16x128xi32>
    %c0_i32_2 = arith.constant 0 : i32
    %9 = arith.cmpi slt, %2, %c0_i32_2 : i32
    %10 = vector.broadcast %9 : i1 to vector<16x128xi1>
    %11 = vector.broadcast %10 : vector<16x128xi1> to vector<16x128xi1>
    %12 = arith.xori %8, %11 : vector<16x128xi1>
    %13 = arith.andi %12, %6 : vector<16x128xi1>
    %14 = vector.broadcast %2 : i32 to vector<16x128xi32>
    %15 = arith.addi %4, %14 : vector<16x128xi32>
    %16 = arith.select %13, %15, %4 : vector<16x128xi1>, vector<16x128xi32>
    %c0 = arith.constant 0 : index
    %c0_3 = arith.constant 0 : index
    %c0_4 = arith.constant 0 : index
    %17 = vector.load %arg1[%c0, %c0_3, %c0_4] : memref<1x16x128xbf16, #tpu.memory_space<vmem>>, vector<1x16x128xbf16>
    %18 = vector.shape_cast %17 : vector<1x16x128xbf16> to vector<16x128xbf16>
    %c0_5 = arith.constant 0 : index
    %c0_6 = arith.constant 0 : index
    %19 = vector.load %arg2[%c0_5, %c0_6] : memref<128x384xbf16, #tpu.memory_space<vmem>>, vector<128x384xbf16>
    %cst = arith.constant dense<0.000000e+00> : vector<16x384xf32>
    %20 = tpu.matmul %18, %19, %cst {dimension_numbers = #tpu.dot_dimension_numbers<[1], [0], [0], [1], [0, 0, 1, 1], [], []>} : vector<16x128xbf16>, vector<128x384xbf16>, vector<16x384xf32> -> vector<16x384xf32>
    %21 = vector.extract_strided_slice %20 {offsets = [0, 128], sizes = [16, 128], strides = [1, 1]} : vector<16x384xf32> to vector<16x128xf32>
    %22 = vector.extract_strided_slice %20 {offsets = [0, 0], sizes = [16, 128], strides = [1, 1]} : vector<16x384xf32> to vector<16x128xf32>
    %c1_i32_7 = arith.constant 1 : i32
    %23 = tpu.dynamic_rotate %22 by %c1_i32_7 dim 0 : vector<16x128xf32>, i32 -> vector<16x128xf32>
    %c1_i32_8 = arith.constant 1 : i32
    %24 = vector.broadcast %c1_i32_8 : i32 to vector<16x128xi32>
    %25 = arith.cmpi sge, %16, %24 : vector<16x128xi32>
    %cst_9 = arith.constant 0.000000e+00 : f32
    %26 = vector.broadcast %cst_9 : f32 to vector<16x128xf32>
    %27 = arith.select %25, %23, %26 : vector<16x128xi1>, vector<16x128xf32>
    %28 = arith.addf %21, %27 : vector<16x128xf32>
    %29 = vector.extract_strided_slice %20 {offsets = [0, 256], sizes = [16, 128], strides = [1, 1]} : vector<16x384xf32> to vector<16x128xf32>
    %c15_i32 = arith.constant 15 : i32
    %30 = tpu.dynamic_rotate %29 by %c15_i32 dim 0 : vector<16x128xf32>, i32 -> vector<16x128xf32>
    %c15_i32_10 = arith.constant 15 : i32
    %31 = vector.broadcast %c15_i32_10 : i32 to vector<16x128xi32>
    %32 = arith.cmpi slt, %16, %31 : vector<16x128xi32>
    %cst_11 = arith.constant 0.000000e+00 : f32
    %33 = vector.broadcast %cst_11 : f32 to vector<16x128xf32>
    %34 = arith.select %32, %30, %33 : vector<16x128xi1>, vector<16x128xf32>
    %35 = arith.addf %28, %34 : vector<16x128xf32>
    %c0_12 = arith.constant 0 : index
    %c0_13 = arith.constant 0 : index
    %36 = vector.load %arg3[%c0_12, %c0_13] : memref<1x128xf32, #tpu.memory_space<vmem>>, vector<1x128xf32>
    %37 = vector.broadcast %36 : vector<1x128xf32> to vector<16x128xf32>
    %38 = arith.addf %35, %37 : vector<16x128xf32>
    %cst_14 = arith.constant 0.000000e+00 : f32
    %39 = vector.broadcast %cst_14 : f32 to vector<16x128xf32>
    %40 = arith.cmpf ogt, %38, %39 : vector<16x128xf32>
    %cst_15 = arith.constant 0.00999999977 : f32
    %41 = vector.broadcast %cst_15 : f32 to vector<16x128xf32>
    %42 = arith.mulf %41, %38 : vector<16x128xf32>
    %43 = arith.select %40, %38, %42 : vector<16x128xi1>, vector<16x128xf32>
    %44 = arith.truncf %43 : vector<16x128xf32> to vector<16x128xbf16>
    %c0_16 = arith.constant 0 : index
    %c0_17 = arith.constant 0 : index
    %45 = vector.load %arg4[%c0_16, %c0_17] : memref<128x384xbf16, #tpu.memory_space<vmem>>, vector<128x384xbf16>
    %cst_18 = arith.constant dense<0.000000e+00> : vector<16x384xf32>
    %46 = tpu.matmul %44, %45, %cst_18 {dimension_numbers = #tpu.dot_dimension_numbers<[1], [0], [0], [1], [0, 0, 1, 1], [], []>} : vector<16x128xbf16>, vector<128x384xbf16>, vector<16x384xf32> -> vector<16x384xf32>
    %47 = vector.extract_strided_slice %46 {offsets = [0, 128], sizes = [16, 128], strides = [1, 1]} : vector<16x384xf32> to vector<16x128xf32>
    %48 = vector.extract_strided_slice %46 {offsets = [0, 0], sizes = [16, 128], strides = [1, 1]} : vector<16x384xf32> to vector<16x128xf32>
    %c1_i32_19 = arith.constant 1 : i32
    %49 = tpu.dynamic_rotate %48 by %c1_i32_19 dim 0 : vector<16x128xf32>, i32 -> vector<16x128xf32>
    %c1_i32_20 = arith.constant 1 : i32
    %50 = vector.broadcast %c1_i32_20 : i32 to vector<16x128xi32>
    %51 = arith.cmpi sge, %16, %50 : vector<16x128xi32>
    %cst_21 = arith.constant 0.000000e+00 : f32
    %52 = vector.broadcast %cst_21 : f32 to vector<16x128xf32>
    %53 = arith.select %51, %49, %52 : vector<16x128xi1>, vector<16x128xf32>
    %54 = arith.addf %47, %53 : vector<16x128xf32>
    %55 = vector.extract_strided_slice %46 {offsets = [0, 256], sizes = [16, 128], strides = [1, 1]} : vector<16x384xf32> to vector<16x128xf32>
    %c15_i32_22 = arith.constant 15 : i32
    %56 = tpu.dynamic_rotate %55 by %c15_i32_22 dim 0 : vector<16x128xf32>, i32 -> vector<16x128xf32>
    %c15_i32_23 = arith.constant 15 : i32
    %57 = vector.broadcast %c15_i32_23 : i32 to vector<16x128xi32>
    %58 = arith.cmpi slt, %16, %57 : vector<16x128xi32>
    %cst_24 = arith.constant 0.000000e+00 : f32
    %59 = vector.broadcast %cst_24 : f32 to vector<16x128xf32>
    %60 = arith.select %58, %56, %59 : vector<16x128xi1>, vector<16x128xf32>
    %61 = arith.addf %54, %60 : vector<16x128xf32>
    %c0_25 = arith.constant 0 : index
    %c0_26 = arith.constant 0 : index
    %62 = vector.load %arg5[%c0_25, %c0_26] : memref<1x128xf32, #tpu.memory_space<vmem>>, vector<1x128xf32>
    %63 = vector.broadcast %62 : vector<1x128xf32> to vector<16x128xf32>
    %64 = arith.addf %61, %63 : vector<16x128xf32>
    %cst_27 = arith.constant 0.000000e+00 : f32
    %65 = vector.broadcast %cst_27 : f32 to vector<16x128xf32>
    %66 = arith.cmpf ogt, %64, %65 : vector<16x128xf32>
    %cst_28 = arith.constant 0.00999999977 : f32
    %67 = vector.broadcast %cst_28 : f32 to vector<16x128xf32>
    %68 = arith.mulf %67, %64 : vector<16x128xf32>
    %69 = arith.select %66, %64, %68 : vector<16x128xi1>, vector<16x128xf32>
    %70 = arith.truncf %69 : vector<16x128xf32> to vector<16x128xbf16>
    %c0_29 = arith.constant 0 : index
    %c0_30 = arith.constant 0 : index
    %71 = vector.load %arg6[%c0_29, %c0_30] : memref<128x512xbf16, #tpu.memory_space<vmem>>, vector<128x512xbf16>
    %cst_31 = arith.constant dense<0.000000e+00> : vector<16x512xf32>
    %72 = tpu.matmul %70, %71, %cst_31 {dimension_numbers = #tpu.dot_dimension_numbers<[1], [0], [0], [1], [0, 0, 1, 1], [], []>} : vector<16x128xbf16>, vector<128x512xbf16>, vector<16x512xf32> -> vector<16x512xf32>
    %c0_32 = arith.constant 0 : index
    %c0_33 = arith.constant 0 : index
    %73 = vector.load %arg7[%c0_32, %c0_33] : memref<1x512xf32, #tpu.memory_space<vmem>>, vector<1x512xf32>
    %74 = vector.broadcast %73 : vector<1x512xf32> to vector<16x512xf32>
    %75 = arith.addf %72, %74 : vector<16x512xf32>
    %cst_34 = arith.constant 0.000000e+00 : f32
    %76 = vector.broadcast %cst_34 : f32 to vector<16x512xf32>
    %77 = arith.cmpf ogt, %75, %76 : vector<16x512xf32>
    %cst_35 = arith.constant 0.00999999977 : f32
    %78 = vector.broadcast %cst_35 : f32 to vector<16x512xf32>
    %79 = arith.mulf %78, %75 : vector<16x512xf32>
    %80 = arith.select %77, %75, %79 : vector<16x512xi1>, vector<16x512xf32>
    %81 = vector.shape_cast %80 : vector<16x512xf32> to vector<1x16x512xf32>
    %c0_36 = arith.constant 0 : index
    %c0_37 = arith.constant 0 : index
    %c0_38 = arith.constant 0 : index
    %82 = vector.load %arg8[%c0_36, %c0_37, %c0_38] : memref<1x16x512xf32, #tpu.memory_space<vmem>>, vector<1x16x512xf32>
    tpu.vector_store %arg8[%c0_36, %c0_37, %c0_38], %81 {strides = array<i32>} : memref<1x16x512xf32, #tpu.memory_space<vmem>>, vector<1x16x512xf32>,
    return
  }
  func.func @transform_0(%arg0: i32) -> (i32, i32, i32) {
    %c0_i32 = arith.constant 0 : i32
    %c0_i32_0 = arith.constant 0 : i32
    %c0_i32_1 = arith.constant 0 : i32
    return %arg0, %c0_i32, %c0_i32_0 : i32, i32, i32
  }
  func.func @transform_1(%arg0: i32) -> (i32, i32) {
    %c0_i32 = arith.constant 0 : i32
    %c0_i32_0 = arith.constant 0 : i32
    %c0_i32_1 = arith.constant 0 : i32
    return %c0_i32, %c0_i32_0 : i32, i32
  }
  func.func @transform_2(%arg0: i32) -> (i32, i32) {
    %c0_i32 = arith.constant 0 : i32
    %c0_i32_0 = arith.constant 0 : i32
    %c0_i32_1 = arith.constant 0 : i32
    return %c0_i32, %c0_i32_0 : i32, i32
  }
  func.func @transform_3(%arg0: i32) -> (i32, i32) {
    %c0_i32 = arith.constant 0 : i32
    %c0_i32_0 = arith.constant 0 : i32
    %c0_i32_1 = arith.constant 0 : i32
    return %c0_i32, %c0_i32_0 : i32, i32
  }
  func.func @transform_4(%arg0: i32) -> (i32, i32) {
    %c0_i32 = arith.constant 0 : i32
    %c0_i32_0 = arith.constant 0 : i32
    %c0_i32_1 = arith.constant 0 : i32
    return %c0_i32, %c0_i32_0 : i32, i32
  }
  func.func @transform_5(%arg0: i32) -> (i32, i32) {
    %c0_i32 = arith.constant 0 : i32
    %c0_i32_0 = arith.constant 0 : i32
    %c0_i32_1 = arith.constant 0 : i32
    return %c0_i32, %c0_i32_0 : i32, i32
  }
  func.func @transform_6(%arg0: i32) -> (i32, i32) {
    %c0_i32 = arith.constant 0 : i32
    %c0_i32_0 = arith.constant 0 : i32
    %c0_i32_1 = arith.constant 0 : i32
    return %c0_i32, %c0_i32_0 : i32, i32
  }
  func.func @transform_7(%arg0: i32) -> (i32, i32, i32) {
    %c0_i32 = arith.constant 0 : i32
    %c0_i32_0 = arith.constant 0 : i32
    %c0_i32_1 = arith.constant 0 : i32
    return %arg0, %c0_i32, %c0_i32_0 : i32, i32, i32
  }
}

</mosaic_0001>

<bundles_post_ra>
// kernel: double_conv_u1_forward.1
= control target key start
LH: loop header
LB: loop body
LE: loop exit
PB: predicated region body
PF: predicated region fallthrough
CT: control target
= control target key end

     0   :  { %s1589_s24 = smov 0   ;;  %s1939_s0 = inlined_call_operand.vmem [shape: bf16[2,16,128], index: 0, kind: input, shape index: {}]   ;;  %s1940_s1 = inlined_call_operand.vmem [shape: bf16[128,384], index: 1, kind: input, shape index: {}]   ;;  %s1941_s2 = inlined_call_operand.vmem [shape: f32[1,128], index: 2, kind: input, shape index: {}]   ;;  %s1942_s3 = inlined_call_operand.vmem [shape: bf16[128,384], index: 3, kind: input, shape index: {}]   ;;  %s1943_s4 = inlined_call_operand.vmem [shape: f32[1,128], index: 4, kind: input, shape index: {}]   ;;  %s1944_s5 = inlined_call_operand.vmem [shape: bf16[128,512], index: 5, kind: input, shape index: {}]   ;;  %s1945_s6 = inlined_call_operand.vmem [shape: f32[1,512], index: 6, kind: input, shape index: {}]   ;;  %s1946_s7 = inlined_call_operand.vmem [shape: f32[2,16,512], index: 7, kind: output, shape index: {}]  }
   0x1 LB: > { %s1260_s25 = sadd.s32 4294967295, %s1544_s24   ;;  %p1264_p0 = scmp.ge.s32.totalorder %s1544_s24, 1  ;;  %s1544_s24 = sphi %s1589_s24, %s17_s24  }
   0x2   : > { %p237_p1 = scmp.lt.s32.totalorder %s1544_s24, 3 }
   0x4   : > { %p238_p2 = pnand %p1264_p0, %p237_p1 }
   0x5   : > { %p269_p3 = scmp.lt.s32.totalorder (!%p238_p2), %s1260_s25, 1 }
   0x6   : > { %241 = sbr.rel (%p238_p2) target bundleno = 676 (0x2a4), region = 48 }
   0xb   : > { %v1425_v0 = vld [vmem:[%s1940_s1 + $0xac] ss:$12 sps:$4 sm:$0xff]   ;;  %v1546_v1 = vmov 0.0   ;;  %v1427_v2 = vld [vmem:[%s1940_s1 + $0xb0] ss:$12 sps:$4 sm:$0xff]   ;;  %vm1547_vm0 = vmmov 0   ;;  %v280_v53 = vlaneseq }
   0xc   : > { %1374 = vmatprep.subr.bf16.mxu1 %v1546_v1  ;;  %1390 = vmatprep.mubr.msk.bf16.mxu1 %vm1547_vm0, %v1546_v1  ;;  %v1428_v3 = vld [vmem:[%s1940_s1 + $0xa8] ss:$12 sps:$4 sm:$0xff]   ;;  %v1548_v5 = vmov 0   ;;  %v1431_v6 = vld [vmem:[%s1940_s1 + $0x98] ss:$12 sps:$4 sm:$0xff]   ;;  %s1952_s25 = smov (!%p269_p3, %s1260_s25), 1 }
   0xd   : > { %475 = vmatprep.subr.bf16.mxu0 %v1425_v0  ;;  %1375 = vmatpush3.bf16.msra.mxu1 %v1427_v2  ;;  %v1429_v4 = vld [vmem:[%s1940_s1 + $0x94] ss:$12 sps:$4 sm:$0xff]   ;;  %v1432_v7 = vld [vmem:[%s1940_s1 + $0x90] ss:$12 sps:$4 sm:$0xff]   ;;  %v1436_v10 = vld [vmem:[%s1940_s1 + $0x78] ss:$12 sps:$4 sm:$0xff]  }
   0xe   : > { %507 = vmatprep.mubr.bf16.mxu0 %v1548_v5  ;;  %476 = vmatpush1.bf16.msra.mxu0 %v1428_v3  ;;  %v1433_v8 = vld [vmem:[%s1940_s1 + $0x7c] ss:$12 sps:$4 sm:$0xff]   ;;  %v1435_v9 = vld [vmem:[%s1940_s1 + $0x80] ss:$12 sps:$4 sm:$0xff]   ;;  %v1437_v11 = vld [vmem:[%s1940_s1 + $0x64] ss:$12 sps:$4 sm:$0xff]  }
   0xf   : > { %1376 = vmatprep.subr.bf16.mxu1 %v1546_v1  ;;  %477 = vmatprep.subr.bf16.mxu0 %v1429_v4  ;;  %v1439_v12 = vld [vmem:[%s1940_s1 + $0x68] ss:$12 sps:$4 sm:$0xff]   ;;  %v1440_v13 = vld [vmem:[%s1940_s1 + $0x60] ss:$12 sps:$4 sm:$0xff]   ;;  %s1354_s8 = sshll.u32 %s1952_s25, 3  ;;  %v1779_v54 = vshrl.u32 %v280_v53, 7 }
  0x10   : > { %v1441_v14 = vld [vmem:[%s1940_s1 + $0x4c] ss:$12 sps:$4 sm:$0xff]   ;;  %v1443_v15 = vld [vmem:[%s1940_s1 + $0x50] ss:$12 sps:$4 sm:$0xff]   ;;  %v1444_v16 = vld [vmem:[%s1940_s1 + $0x48] ss:$12 sps:$4 sm:$0xff]   ;;  %s273_s17 = scalar_lea.vmem %s1939_s0, %s1354_s8 }
  0x11   : > { %1377 = vmatpush3.bf16.msra.mxu1 %v1431_v6  ;;  %v1445_v17 = vld [vmem:[%s1940_s1 + $0x34] ss:$12 sps:$4 sm:$0xff]   ;;  %v1447_v18 = vld [vmem:[%s1940_s1 + $0x38] ss:$12 sps:$4 sm:$0xff]   ;;  %v1448_v19 = vld [vmem:[%s1940_s1 + $0x30] ss:$12 sps:$4 sm:$0xff]  }
  0x12   : > { %478 = vmatpush1.bf16.msra.mxu0 %v1432_v7  ;;  %1378 = vmatprep.subr.bf16.mxu1 %v1546_v1  ;;  %v1449_v20 = vld [vmem:[%s1940_s1 + $0x1c] ss:$12 sps:$4 sm:$0xff]   ;;  %v1451_v21 = vld [vmem:[%s1940_s1 + $0x20] ss:$12 sps:$4 sm:$0xff]   ;;  %v1452_v22 = vld [vmem:[%s1940_s1 + $0x18] ss:$12 sps:$4 sm:$0xff]  }
  0x13   : > { %479 = vmatprep.subr.bf16.mxu0 %v1433_v8  ;;  %v1453_v23 = vld [vmem:[%s1940_s1 + $0x4] ss:$12 sps:$4 sm:$0xff]   ;;  %v1455_v24 = vld [vmem:[%s1940_s1 + $0x8] ss:$12 sps:$4 sm:$0xff]   ;;  %v1456_v25 = vld [vmem:[%s1940_s1] ss:$12 sps:$4 sm:$0xff]  }
  0x14   : > { %v1460_v26 = vld [vmem:[%s1942_s3 + $0xac] ss:$12 sps:$4 sm:$0xff]   ;;  %v1457_v27 = vld [vmem:[%s273_s17] sm:$0xff]   ;;  %v1461_v28 = vld [vmem:[%s1942_s3 + $0xb0] ss:$12 sps:$4 sm:$0xff]   ;;  %v282_v55 = vadd.s32 8, %v1779_v54 }
  0x15   : > { %1379 = vmatpush3.bf16.msra.mxu1 %v1435_v9  ;;  %v1458_v29 = vld [vmem:[%s1942_s3 + $0xa8] ss:$12 sps:$4 sm:$0xff]   ;;  %v1465_v31 = vld [vmem:[%s1942_s3 + $0x98] ss:$12 sps:$4 sm:$0xff]   ;;  %v1462_v32 = vld [vmem:[%s1942_s3 + $0x90] ss:$12 sps:$4 sm:$0xff]  }
  0x16   : > { %480 = vmatpush1.bf16.msra.mxu0 %v1436_v10  ;;  %1380 = vmatprep.subr.bf16.mxu1 %v1546_v1  ;;  %v1464_v30 = vld [vmem:[%s1942_s3 + $0x94] ss:$12 sps:$4 sm:$0xff]   ;;  %v1468_v33 = vld [vmem:[%s1942_s3 + $0x7c] ss:$12 sps:$4 sm:$0xff]   ;;  %v1466_v35 = vld [vmem:[%s1942_s3 + $0x78] ss:$12 sps:$4 sm:$0xff]  }
  0x17   : > { %481 = vmatprep.subr.bf16.mxu0 %v1437_v11  ;;  %v1469_v34 = vld [vmem:[%s1942_s3 + $0x80] ss:$12 sps:$4 sm:$0xff]   ;;  %v1472_v36 = vld [vmem:[%s1942_s3 + $0x64] ss:$12 sps:$4 sm:$0xff]   ;;  %v1473_v38 = vld [vmem:[%s1942_s3 + $0x68] ss:$12 sps:$4 sm:$0xff]  }
  0x18   : > { %v1470_v37 = vld [vmem:[%s1942_s3 + $0x60] ss:$12 sps:$4 sm:$0xff]   ;;  %v1474_v40 = vld [vmem:[%s1942_s3 + $0x48] ss:$12 sps:$4 sm:$0xff]   ;;  %v1477_v41 = vld [vmem:[%s1942_s3 + $0x50] ss:$12 sps:$4 sm:$0xff]  }
  0x19   : > { %1381 = vmatpush3.bf16.msra.mxu1 %v1439_v12  ;;  %v1476_v39 = vld [vmem:[%s1942_s3 + $0x4c] ss:$12 sps:$4 sm:$0xff]   ;;  %v1480_v42 = vld [vmem:[%s1942_s3 + $0x34] ss:$12 sps:$4 sm:$0xff]   ;;  %v1478_v43 = vld [vmem:[%s1942_s3 + $0x30] ss:$12 sps:$4 sm:$0xff]  }
  0x1a   : > { %482 = vmatpush1.bf16.msra.mxu0 %v1440_v13  ;;  %1382 = vmatprep.subr.bf16.mxu1 %v1546_v1  ;;  %v1481_v44 = vld [vmem:[%s1942_s3 + $0x38] ss:$12 sps:$4 sm:$0xff]   ;;  %v1484_v45 = vld [vmem:[%s1942_s3 + $0x1c] ss:$12 sps:$4 sm:$0xff]   ;;  %v1485_v47 = vld [vmem:[%s1942_s3 + $0x20] ss:$12 sps:$4 sm:$0xff]  }
  0x1b   : > { %483 = vmatprep.subr.bf16.mxu0 %v1441_v14  ;;  %v1482_v46 = vld [vmem:[%s1942_s3 + $0x18] ss:$12 sps:$4 sm:$0xff]   ;;  %v1486_v49 = vld [vmem:[%s1942_s3] ss:$12 sps:$4 sm:$0xff]   ;;  %v1489_v50 = vld [vmem:[%s1942_s3 + $0x8] ss:$12 sps:$4 sm:$0xff]  }
  0x1c   : > { %v1488_v48 = vld [vmem:[%s1942_s3 + $0x4] ss:$12 sps:$4 sm:$0xff]   ;;  %v1495_v52 = vld [vmem:[%s1944_s5 + $0xec] ss:$16 sps:$4 sm:$0xff]   ;;  %v287_v59 = vand.u32 15, %v1779_v54  ;;  %v294_v62 = vand.u32 15, %v282_v55 }
  0x1d   : > { %1383 = vmatpush3.bf16.msra.mxu1 %v1443_v15  ;;  %v1492_v51 = vld [vmem:[%s1944_s5 + $0xe4] ss:$16 sps:$4 sm:$0xff]   ;;  %vm572_vm1 = vcmp.lt.s32.totalorder %v1779_v54, 7  ;;  %vm561_vm2 = vcmp.lt.s32.totalorder %v1779_v54, 1  ;;  %v1537_v53 = vld [vmem:[%s1944_s5 + $0xc] ss:$16 sps:$4 sm:$0xff]  }
  0x1e   : > { %484 = vmatpush1.bf16.msra.mxu0 %v1444_v16  ;;  %1384 = vmatprep.subr.bf16.mxu1 %v1546_v1  ;;  %vm1785_vm3 = vcmp.ge.s32.totalorder %v287_v59, 1  ;;  %vm1791_vm4 = vcmp.lt.s32.totalorder %v294_v62, 15  ;;  %v1294_v16 = vld [vmem:[%s1941_s2] ss:$0 sm:$0xff]  ;;  %s1355_s28 = sshll.u32 %s1952_s25, 6 }
  0x1f   : > { %485 = vmatprep.subr.bf16.mxu0 %v1445_v17  ;;  %v1532_v55 = vld [vmem:[%s1944_s5] ss:$16 sps:$4 sm:$0xff]   ;;  %s1926_s8 = scalar_lea.vmem %s1946_s7, %s1355_s28 }
  0x21   : > { %1385 = vmatpush3.bf16.msra.mxu1 %v1447_v18 }
  0x22   : > { %486 = vmatpush1.bf16.msra.mxu0 %v1448_v19  ;;  %1386 = vmatprep.subr.bf16.mxu1 %v1546_v1 }
  0x23   : > { %487 = vmatprep.subr.bf16.mxu0 %v1449_v20 }
  0x25   : > { %1387 = vmatpush3.bf16.msra.mxu1 %v1451_v21 }
  0x26   : > { %488 = vmatpush1.bf16.msra.mxu0 %v1452_v22  ;;  %1388 = vmatprep.subr.bf16.mxu1 %v1546_v1 }
  0x27   : > { %489 = vmatprep.subr.bf16.mxu0 %v1453_v23 }
  0x29   : > { %1389 = vmatpush3.bf16.msra.mxu1 %v1455_v24 }
  0x2a   : > { %490 = vmatpush1.bf16.msra.mxu0 %v1456_v25  ;;  %1394 = vmatprep.subr.bf16.mxu1 %v1546_v1 }
  0x2b   : > { %757 = vmatprep.subr.bf16.mxu0 %v1460_v26  ;;  %v1490_v26 = vld [vmem:[%s1944_s5 + $0xe0] ss:$16 sps:$4 sm:$0xff]  }
  0x2c   : > { %1391 = vmatmul.mubr.bf16.vlgmr.msra.gmra.mxu1 %v1457_v27 }
  0x2d   : > { %508 = vmatmul.mubr.bf16.vlgmr.msra.gmra.mxu0 %v1457_v27  ;;  %1395 = vmatpush3.bf16.msra.mxu1 %v1461_v28  ;;  %v1493_v27 = vld [vmem:[%s1944_s5 + $0xe8] ss:$16 sps:$4 sm:$0xff]  }
  0x2e   : > { %758 = vmatpush1.bf16.msra.mxu0 %v1458_v29  ;;  %1396 = vmatprep.subr.bf16.mxu1 %v1546_v1  ;;  %v1498_v29 = vld [vmem:[%s1944_s5 + $0xc4] ss:$16 sps:$4 sm:$0xff]  }
  0x2f   : > { %759 = vmatprep.subr.bf16.mxu0 %v1464_v30  ;;  %789 = vmatprep.mubr.bf16.mxu0 %v1548_v5  ;;  %v1501_v30 = vld [vmem:[%s1944_s5 + $0xcc] ss:$16 sps:$4 sm:$0xff]  }
  0x30   : > { %1410 = vmatprep.mubr.msk.bf16.mxu1 %vm1547_vm0, %v1546_v1 }
  0x31   : > { %1397 = vmatpush3.bf16.msra.mxu1 %v1465_v31  ;;  %v1496_v31 = vld [vmem:[%s1944_s5 + $0xc0] ss:$16 sps:$4 sm:$0xff]  }
  0x32   : > { %760 = vmatpush1.bf16.msra.mxu0 %v1462_v32  ;;  %1398 = vmatprep.subr.bf16.mxu1 %v1546_v1  ;;  %v1499_v32 = vld [vmem:[%s1944_s5 + $0xc8] ss:$16 sps:$4 sm:$0xff]  }
  0x33   : > { %761 = vmatprep.subr.bf16.mxu0 %v1468_v33  ;;  %v1504_v33 = vld [vmem:[%s1944_s5 + $0xa4] ss:$16 sps:$4 sm:$0xff]  }
  0x35   : > { %1399 = vmatpush3.bf16.msra.mxu1 %v1469_v34  ;;  %v1507_v34 = vld [vmem:[%s1944_s5 + $0xac] ss:$16 sps:$4 sm:$0xff]  }
  0x36   : > { %762 = vmatpush1.bf16.msra.mxu0 %v1466_v35  ;;  %1400 = vmatprep.subr.bf16.mxu1 %v1546_v1  ;;  %v1502_v35 = vld [vmem:[%s1944_s5 + $0xa0] ss:$16 sps:$4 sm:$0xff]  }
  0x37   : > { %763 = vmatprep.subr.bf16.mxu0 %v1472_v36  ;;  %v1505_v36 = vld [vmem:[%s1944_s5 + $0xa8] ss:$16 sps:$4 sm:$0xff]  }
  0x39   : > { %1401 = vmatpush3.bf16.msra.mxu1 %v1473_v38  ;;  %v1508_v38 = vld [vmem:[%s1944_s5 + $0x80] ss:$16 sps:$4 sm:$0xff]  }
  0x3a   : > { %764 = vmatpush1.bf16.msra.mxu0 %v1470_v37  ;;  %1402 = vmatprep.subr.bf16.mxu1 %v1546_v1  ;;  %v1510_v37 = vld [vmem:[%s1944_s5 + $0x84] ss:$16 sps:$4 sm:$0xff]  }
  0x3b   : > { %765 = vmatprep.subr.bf16.mxu0 %v1476_v39  ;;  %v1511_v39 = vld [vmem:[%s1944_s5 + $0x88] ss:$16 sps:$4 sm:$0xff]  }
  0x3d   : > { %1403 = vmatpush3.bf16.msra.mxu1 %v1477_v41  ;;  %v1519_v41 = vld [vmem:[%s1944_s5 + $0x6c] ss:$16 sps:$4 sm:$0xff]  }
  0x3e   : > { %766 = vmatpush1.bf16.msra.mxu0 %v1474_v40  ;;  %1404 = vmatprep.subr.bf16.mxu1 %v1546_v1  ;;  %v1516_v40 = vld [vmem:[%s1944_s5 + $0x64] ss:$16 sps:$4 sm:$0xff]  }
  0x3f   : > { %767 = vmatprep.subr.bf16.mxu0 %v1480_v42  ;;  %v1514_v42 = vld [vmem:[%s1944_s5 + $0x60] ss:$16 sps:$4 sm:$0xff]  }
  0x41   : > { %1405 = vmatpush3.bf16.msra.mxu1 %v1481_v44  ;;  %v1522_v44 = vld [vmem:[%s1944_s5 + $0x44] ss:$16 sps:$4 sm:$0xff]  }
  0x42   : > { %768 = vmatpush1.bf16.msra.mxu0 %v1478_v43  ;;  %1406 = vmatprep.subr.bf16.mxu1 %v1546_v1  ;;  %v1517_v43 = vld [vmem:[%s1944_s5 + $0x68] ss:$16 sps:$4 sm:$0xff]  }
  0x43   : > { %769 = vmatprep.subr.bf16.mxu0 %v1484_v45  ;;  %v1525_v45 = vld [vmem:[%s1944_s5 + $0x4c] ss:$16 sps:$4 sm:$0xff]  }
  0x45   : > { %1407 = vmatpush3.bf16.msra.mxu1 %v1485_v47  ;;  %v1523_v47 = vld [vmem:[%s1944_s5 + $0x48] ss:$16 sps:$4 sm:$0xff]  }
  0x46   : > { %770 = vmatpush1.bf16.msra.mxu0 %v1482_v46  ;;  %1408 = vmatprep.subr.bf16.mxu1 %v1546_v1  ;;  %v1520_v46 = vld [vmem:[%s1944_s5 + $0x40] ss:$16 sps:$4 sm:$0xff]  }
  0x47   : > { %771 = vmatprep.subr.bf16.mxu0 %v1488_v48  ;;  %v1528_v48 = vld [vmem:[%s1944_s5 + $0x24] ss:$16 sps:$4 sm:$0xff]  }
  0x49   : > { %1409 = vmatpush3.bf16.msra.mxu1 %v1489_v50  ;;  %v1526_v50 = vld [vmem:[%s1944_s5 + $0x20] ss:$16 sps:$4 sm:$0xff]  }
  0x4a   : > { %772 = vmatpush1.bf16.msra.mxu0 %v1486_v49  ;;  %1130 = vmatprep.subr.bf16.mxu1 %v1495_v52  ;;  %v1531_v49 = vld [vmem:[%s1944_s5 + $0x2c] ss:$16 sps:$4 sm:$0xff]   ;;  %v1534_v52 = vld [vmem:[%s1944_s5 + $0x4] ss:$16 sps:$4 sm:$0xff]  }
  0x4b   : > { %1087 = vmatprep.subr.bf16.mxu0 %v1492_v51  ;;  %v1529_v51 = vld [vmem:[%s1944_s5 + $0x28] ss:$16 sps:$4 sm:$0xff]  }
  0xec   : > { %v552_v56 = vpop.f32.mrf.mxu1 }
  0xed   : > { %v509_v57 = vpop.f32.mrf.mxu0  ;;  %v570_v60 = vrot.slane %v552_v56, 1  ;;  %v1535_v56 = vld [vmem:[%s1944_s5 + $0x8] ss:$16 sps:$4 sm:$0xff]  }
  0xee   : > { %v1392_v58 = vpop.f32.mrf.mxu1  ;;  %v559_v2 = vrot.slane %v509_v57, 7 }
  0xef   : > { %v511_v61 = vpop.f32.mrf.mxu0 }
  0xf0   : > { %v555_v63 = vpop.f32.mrf.mxu1 }
  0xf1   : > { %v571_v0 = vrot.slane %v555_v63, 1  ;;  %v513_v1 = vpop.f32.mrf.mxu0 }
  0xf2   : > { %v560_v3 = vrot.slane %v513_v1, 7  ;;  %v1393_v6 = vpop.f32.mrf.mxu1 }
  0xf3   : > { %v515_v7 = vpop.f32.mrf.mxu0  ;;  %v574_v8 = vsel %vm572_vm1, %v571_v0, %v570_v60  ;;  %v573_v17 = vsel %vm572_vm1, %v570_v60, %v571_v0 }
  0xf4   : > { %v563_v10 = vsel %vm561_vm2, %v560_v3, %v559_v2  ;;  %v562_v11 = vsel %vm561_vm2, %v559_v2, %v560_v3  ;;  %v578_v15 = vsel %vm1791_vm4, %v574_v8, 0.0 }
  0xf5   : > { %v566_v12 = vsel %vm1785_vm3, %v563_v10, 0.0  ;;  %v569_v13 = vadd.f32 %v562_v11, %v515_v7 }
  0xf6   : > { %v568_v14 = vadd.f32 %v566_v12, %v511_v61 }
  0xf7   : > { %v580_v18 = vadd.f32 %v578_v15, %v569_v13  ;;  %v1319_v15 = vld [vmem:[%s1943_s4] ss:$0 sm:$0xff] }
  0xf8   : > { %v579_v19 = vadd.f32 %v573_v17, %v568_v14 }
  0xf9   : > { %v589_v20 = vadd.f32 %v1294_v16, %v580_v18 }
  0xfa   : > { %v588_v21 = vadd.f32 %v1294_v16, %v579_v19 }
  0xfb   : > { %vm591_vm5 = vcmp.gt.f32.partialorder %v589_v20, 0.0  ;;  %v593_v22 = vmul.f32 0.01, %v589_v20 }
  0xfc   : > { %v592_v23 = vmul.f32 0.01, %v588_v21  ;;  %vm590_vm6 = vcmp.gt.f32.partialorder %v588_v21, 0.0 }
  0xfd   : > { %v595_v24 = vsel %vm591_vm5, %v589_v20, %v593_v22 }
  0xfe   : > { %v594_v25 = vsel %vm590_vm6, %v588_v21, %v592_v23 }
  0xff   : > { %v596_v28 = vpack.c.bf16 %v595_v24, %v594_v25  ;;  %v909_v24 = vsub.s32 0, %v1779_v54  ;;  %v917_v25 = vsub.s32 2, %v1779_v54 }
 0x101   : > { %790 = vmatmul.mubr.bf16.vlgmr.msra.gmra.mxu0 %v596_v28  ;;  %1411 = vmatmul.mubr.bf16.vlgmr.msra.gmra.mxu1 %v596_v28  ;;  %v921_v28 = vsub.s32 3, %v1779_v54 }
 0x102   : > { %1088 = vmatpush1.bf16.msra.mxu0 %v1490_v26  ;;  %1131 = vmatpush1.bf16.msra.mxu1 %v1493_v27  ;;  %v905_v26 = vld [vmem:[%s1945_s6] sm:$0xf]  ;;  %v913_v27 = vsub.s32 1, %v1779_v54 }
 0x103   : > { %1089 = vmatprep.subr.bf16.mxu0 %v1498_v29  ;;  %1132 = vmatprep.subr.bf16.mxu1 %v1501_v30  ;;  %v910_v29 = vrot.slane %v905_v26, %v909_v24  ;;  %v918_v30 = vrot.slane %v905_v26, %v917_v25 }
 0x104   : > { %1119 = vmatprep.mubr.bf16.mxu0 %v1548_v5  ;;  %1162 = vmatprep.mubr.bf16.mxu1 %v1548_v5  ;;  %v1513_v5 = vld [vmem:[%s1944_s5 + $0x8c] ss:$16 sps:$4 sm:$0xff]  }
 0x106   : > { %1090 = vmatpush1.bf16.msra.mxu0 %v1496_v31  ;;  %1133 = vmatpush1.bf16.msra.mxu1 %v1499_v32 }
 0x107   : > { %1091 = vmatprep.subr.bf16.mxu0 %v1504_v33  ;;  %1134 = vmatprep.subr.bf16.mxu1 %v1507_v34  ;;  %v914_v33 = vrot.slane %v905_v26, %v913_v27  ;;  %v922_v34 = vrot.slane %v905_v26, %v921_v28 }
 0x10a   : > { %1092 = vmatpush1.bf16.msra.mxu0 %v1502_v35  ;;  %1135 = vmatpush1.bf16.msra.mxu1 %v1505_v36 }
 0x10b   : > { %1093 = vmatprep.subr.bf16.mxu0 %v1510_v37  ;;  %1136 = vmatprep.subr.bf16.mxu1 %v1513_v5 }
 0x10e   : > { %1094 = vmatpush1.bf16.msra.mxu0 %v1508_v38  ;;  %1137 = vmatpush1.bf16.msra.mxu1 %v1511_v39 }
 0x10f   : > { %1095 = vmatprep.subr.bf16.mxu0 %v1516_v40  ;;  %1138 = vmatprep.subr.bf16.mxu1 %v1519_v41 }
 0x112   : > { %1096 = vmatpush1.bf16.msra.mxu0 %v1514_v42  ;;  %1139 = vmatpush1.bf16.msra.mxu1 %v1517_v43 }
 0x113   : > { %1097 = vmatprep.subr.bf16.mxu0 %v1522_v44  ;;  %1140 = vmatprep.subr.bf16.mxu1 %v1525_v45 }
 0x116   : > { %1098 = vmatpush1.bf16.msra.mxu0 %v1520_v46  ;;  %1141 = vmatpush1.bf16.msra.mxu1 %v1523_v47 }
 0x117   : > { %1099 = vmatprep.subr.bf16.mxu0 %v1528_v48  ;;  %1142 = vmatprep.subr.bf16.mxu1 %v1531_v49 }
 0x11a   : > { %1100 = vmatpush1.bf16.msra.mxu0 %v1526_v50  ;;  %1143 = vmatpush1.bf16.msra.mxu1 %v1529_v51 }
 0x11b   : > { %1101 = vmatprep.subr.bf16.mxu0 %v1534_v52  ;;  %1144 = vmatprep.subr.bf16.mxu1 %v1537_v53 }
 0x11e   : > { %1102 = vmatpush1.bf16.msra.mxu0 %v1532_v55  ;;  %1145 = vmatpush1.bf16.msra.mxu1 %v1535_v56 }
 0x1c1   : > { %v791_v57 = vpop.f32.mrf.mxu0  ;;  %v834_v58 = vpop.f32.mrf.mxu1 }
 0x1c2   : > { %v841_v63 = vrot.slane %v791_v57, 7  ;;  %v849_v0 = vrot.slane %v834_v58, 1 }
 0x1c3   : > { %v793_v59 = vpop.f32.mrf.mxu0  ;;  %v1412_v60 = vpop.f32.mrf.mxu1 }
 0x1c5   : > { %v795_v61 = vpop.f32.mrf.mxu0  ;;  %v837_v62 = vpop.f32.mrf.mxu1 }
 0x1c6   : > { %v842_v1 = vrot.slane %v795_v61, 7  ;;  %v850_v2 = vrot.slane %v837_v62, 1 }
 0x1c7   : > { %v797_v3 = vpop.f32.mrf.mxu0  ;;  %v1413_v6 = vpop.f32.mrf.mxu1 }
 0x1c8   : > { %v844_v7 = vsel %vm561_vm2, %v842_v1, %v841_v63  ;;  %v843_v8 = vsel %vm561_vm2, %v841_v63, %v842_v1  ;;  %v852_v10 = vsel %vm572_vm1, %v850_v2, %v849_v0  ;;  %v851_v16 = vsel %vm572_vm1, %v849_v0, %v850_v2 }
 0x1c9   : > { %v845_v11 = vsel %vm1785_vm3, %v844_v7, 0.0  ;;  %v848_v12 = vadd.f32 %v843_v8, %v797_v3  ;;  %v854_v13 = vsel %vm1791_vm4, %v852_v10, 0.0 }
 0x1ca   : > { %v847_v14 = vadd.f32 %v845_v11, %v793_v59 }
 0x1cb   : > { %v856_v17 = vadd.f32 %v854_v13, %v848_v12 }
 0x1cc   : > { %v855_v18 = vadd.f32 %v851_v16, %v847_v14 }
 0x1cd   : > { %v865_v19 = vadd.f32 %v1319_v15, %v856_v17 }
 0x1ce   : > { %v864_v20 = vadd.f32 %v1319_v15, %v855_v18 }
 0x1cf   : > { %vm867_vm7 = vcmp.gt.f32.partialorder %v865_v19, 0.0  ;;  %v869_v4 = vmul.f32 0.01, %v865_v19 }
 0x1d0   : > { %v868_v21 = vmul.f32 0.01, %v864_v20  ;;  %vm866_vm8 = vcmp.gt.f32.partialorder %v864_v20, 0.0 }
 0x1d1   : > { %v871_v22 = vsel %vm867_vm7, %v865_v19, %v869_v4 }
 0x1d2   : > { %v870_v9 = vsel %vm866_vm8, %v864_v20, %v868_v21 }
 0x1d3   : > { %v872_v23 = vpack.c.bf16 %v871_v22, %v870_v9 }
 0x1d5   : > { %1120 = vmatmul.mubr.bf16.vlgmr.msra.gmra.mxu0 %v872_v23  ;;  %1163 = vmatmul.mubr.bf16.vlgmr.msra.gmra.mxu1 %v872_v23 }
 0x295   : > { %v1121_v31 = vpop.f32.mrf.mxu0  ;;  %v1164_v32 = vpop.f32.mrf.mxu1 }
 0x296   : > { %v1122_v35 = vadd.f32 %v1121_v31, %v910_v29  ;;  %v1165_v36 = vadd.f32 %v1164_v32, %v918_v30 }
 0x297   : > { %v1123_v37 = vpop.f32.mrf.mxu0  ;;  %v1166_v5 = vpop.f32.mrf.mxu1 }
 0x298   : > { %vm1173_vm9 = vcmp.gt.f32.partialorder %v1122_v35, 0.0  ;;  %v1181_v54 = vmul.f32 0.01, %v1122_v35  ;;  %vm1175_vm10 = vcmp.gt.f32.partialorder %v1165_v36, 0.0  ;;  %v1183_v38 = vmul.f32 0.01, %v1165_v36 }
 0x299   : > { %v1124_v39 = vadd.f32 %v1123_v37, %v914_v33  ;;  %v1167_v40 = vadd.f32 %v1166_v5, %v922_v34  ;;  %v1125_v41 = vpop.f32.mrf.mxu0  ;;  %v1168_v42 = vpop.f32.mrf.mxu1 }
 0x29a   : > { %v1189_v43 = vsel %vm1173_vm9, %v1122_v35, %v1181_v54  ;;  %v1191_v44 = vsel %vm1175_vm10, %v1165_v36, %v1183_v38  ;;  %v1126_v45 = vadd.f32 %v1125_v41, %v910_v29  ;;  %v1169_v46 = vadd.f32 %v1168_v42, %v918_v30 }
 0x29b   : > { %1197 = vst [vmem:[%s1926_s8] sm:$0xff] %v1189_v43  ;;  %1199 = vst [vmem:[%s1926_s8 + $0x10] sm:$0xff] %v1191_v44  ;;  %vm1174_vm11 = vcmp.gt.f32.partialorder %v1124_v39, 0.0  ;;  %v1182_v47 = vmul.f32 0.01, %v1124_v39  ;;  %vm1176_vm12 = vcmp.gt.f32.partialorder %v1167_v40, 0.0  ;;  %v1127_v49 = vpop.f32.mrf.mxu0  ;;  %v1170_v50 = vpop.f32.mrf.mxu1 }
 0x29c   : > { %v1184_v48 = vmul.f32 0.01, %v1167_v40  ;;  %vm1177_vm13 = vcmp.gt.f32.partialorder %v1126_v45, 0.0  ;;  %v1185_v51 = vmul.f32 0.01, %v1126_v45  ;;  %vm1179_vm14 = vcmp.gt.f32.partialorder %v1169_v46, 0.0 }
 0x29d   : > { %v1187_v52 = vmul.f32 0.01, %v1169_v46  ;;  %v1190_v53 = vsel %vm1174_vm11, %v1124_v39, %v1182_v47  ;;  %v1128_v56 = vadd.f32 %v1127_v49, %v914_v33  ;;  %v1171_v57 = vadd.f32 %v1170_v50, %v922_v34 }
 0x29e   : > { %v1192_v55 = vsel %vm1176_vm12, %v1167_v40, %v1184_v48  ;;  %1198 = vst [vmem:[%s1926_s8 + $0x8] sm:$0xff] %v1190_v53  ;;  %v1193_v58 = vsel %vm1177_vm13, %v1126_v45, %v1185_v51 }
 0x29f   : > { %1200 = vst [vmem:[%s1926_s8 + $0x18] sm:$0xff] %v1192_v55  ;;  %v1195_v59 = vsel %vm1179_vm14, %v1169_v46, %v1187_v52  ;;  %1201 = vst [vmem:[%s1926_s8 + $0x20] sm:$0xff] %v1193_v58  ;;  %vm1178_vm15 = vcmp.gt.f32.partialorder %v1128_v56, 0.0  ;;  %v1186_v60 = vmul.f32 0.01, %v1128_v56  ;;  %vm1180_vm0 = vcmp.gt.f32.partialorder %v1171_v57, 0.0 }
 0x2a0   : > { %1203 = vst [vmem:[%s1926_s8 + $0x30] sm:$0xff] %v1195_v59  ;;  %v1188_v61 = vmul.f32 0.01, %v1171_v57 }
 0x2a1   : > { %v1194_v62 = vsel %vm1178_vm15, %v1128_v56, %v1186_v60 }
 0x2a2   : > { %v1196_v63 = vsel %vm1180_vm0, %v1171_v57, %v1188_v61  ;;  %1202 = vst [vmem:[%s1926_s8 + $0x28] sm:$0xff] %v1194_v62 }
 0x2a3   : > { %1204 = vst [vmem:[%s1926_s8 + $0x38] sm:$0xff] %v1196_v63 }
 0x2a4 PF: > { %s17_s24 = sadd.s32 1, %s1544_s24  }
 0x2a5   : > { %p14_p4 = scmp.ge.s32.totalorder %s17_s24, 4  }
 0x2a7   :  { %16 = sbr.rel (!%p14_p4) target bundleno = 1 (0x1), region = 78 }

</bundles_post_ra>
